<compile_context>
chip_gen: v5e
topology: v5e:2x2
jax: 0.10.0
libtpu: 0.0.40
codegen_flags: <defaults>
</compile_context>

<pallas_src>
import functools
import math

import jax
import jax.numpy as jnp
from jax.experimental import pallas as pl
from jax.experimental.pallas import tpu as pltpu


def _pos_enc_kernel(freq_ref, phase_ref, coords_ref, vals_ref, out_ref, *,
                    N, d, additive, C):
    """One point-tile: fused single-pass sin embedding, then add or slice-store."""
    E = 2 * N * d
    coords = coords_ref[...].astype(jnp.float32)                  # (d, TP)

    # Replicate coord rows into the OUTPUT channel layout
    #   [sin_0(d), cos_0(d), sin_1(d), cos_1(d), ...]  ->  (E, TP)
    coords_t = jnp.concatenate([coords] * (2 * N), axis=0)        # (E, TP)

    # Single transcendental pass over the full tile: every output row is
    # sin(freq * coord + phase), with phase = 0 (sin rows) or pi/2 (cos rows).
    # freq/phase are tiny (E, 1) inputs (may not be captured as constants).
    emb = jnp.sin(coords_t * freq_ref[...] + phase_ref[...])      # (E, TP) f32
    emb_c = emb.astype(out_ref.dtype)

    if additive:
        # Add in the values dtype (bf16-safe: emb is computed in f32, cast once).
        out_ref[...] = (vals_ref[...] + emb_c[None, :, :]).astype(out_ref.dtype)
    else:
        # Direct slice stores: no broadcast_to + channel-concat intermediate.
        # (Routing the values passthrough through a ref->ref DMA is a possible
        #  v5e micro-opt; kept as vector stores for lowering robustness.)
        out_ref[:, pl.ds(0, C), :] = vals_ref[...].astype(out_ref.dtype)
        B = out_ref.shape[0]
        for b in range(B):                                        # tiny static unroll
            out_ref[b, pl.ds(C, E), :] = emb_c


def _round_down(x, m):
    return (x // m) * m


def pos_enc(coords, values, *, N=4, additive=True, scale=1.0,
            tile_p=8192, vmem_budget_bytes=24 * 1024 * 1024):
    """Pallas positional-encoding forward.

    coords : (d, P)    float32
    values : (B, C, P) float / bfloat
    returns: (B, C, P) if additive else (B, C + 2*N*d, P)
    """
    d, P = coords.shape
    B, C, P2 = values.shape
    assert P == P2
    E = 2 * N * d
    if additive:
        assert C == E, f"additive pos_enc needs C == 2*N*d ({C} vs {E})"
        C_out = C
    else:
        C_out = C + E

    # Per-output-row frequency / phase constants (cos folded into sin as +pi/2).
    freq_rows, phase_rows = [], []
    for i in range(N):
        w = float(scale) * (2.0 ** i)
        freq_rows += [w] * (2 * d)
        phase_rows += [0.0] * d + [math.pi / 2.0] * d
    freqs = jnp.asarray(freq_rows, dtype=jnp.float32).reshape(E, 1)
    phase = jnp.asarray(phase_rows, dtype=jnp.float32).reshape(E, 1)

    # ---- Tile selection (bandwidth-bound elementwise op) -------------------
    isz = jnp.dtype(values.dtype).itemsize
    # Double-buffered pipelined I/O blocks, bytes per lane of the point axis:
    io_bytes = 2 * (4 * d + isz * B * C + isz * B * C_out)
    # In-kernel temporaries (f32 coords / replica / emb, cast emb, result tile):
    tmp_bytes = 4 * (d + 2 * E) + isz * (E + B * C_out)
    bytes_per_lane = io_bytes + tmp_bytes

    max_tile = max(128, _round_down(vmem_budget_bytes // bytes_per_lane, 128))
    tile = max(128, _round_down(min(tile_p, max_tile), 128))
    if tile >= P:
        if P >= 1024:
            # Keep >= 2 lane-dense grid steps so v7x's two TensorCores and the
            # DMA/compute pipeline actually engage.
            tile = _round_down(pl.cdiv(P, 2), 128)
        else:
            tile = P                      # single full-extent block for tiny P
    grid = (pl.cdiv(P, tile),)            # partial last block OK

    kernel = functools.partial(_pos_enc_kernel, N=N, d=d, additive=additive, C=C)

    # Additive output is shape/dtype-identical to values -> alias (input 3).
    io_aliases = {3: 0} if additive else {}

    return pl.pallas_call(
        kernel,
        out_shape=jax.ShapeDtypeStruct((B, C_out, P), values.dtype),
        grid_spec=pltpu.PrefetchScalarGridSpec(
            num_scalar_prefetch=0,
            grid=grid,
            in_specs=[
                pl.BlockSpec((E, 1), lambda p: (0, 0)),            # freqs
                pl.BlockSpec((E, 1), lambda p: (0, 0)),            # phase
                pl.BlockSpec((d, tile), lambda p: (0, p)),         # coords
                pl.BlockSpec((B, C, tile), lambda p: (0, 0, p)),   # values
            ],
            out_specs=pl.BlockSpec((B, C_out, tile), lambda p: (0, 0, p)),
        ),
        input_output_aliases=io_aliases,
        compiler_params=pltpu.CompilerParams(
            dimension_semantics=("parallel",),
            vmem_limit_bytes=64 * 1024 * 1024),
    )(freqs, phase, coords, values)


def pos_enc_ref(coords, values, *, N=4, additive=True, scale=1.0):
    """Pure-JAX reference (uses true cos, not the +pi/2 phase trick)."""
    embs = []
    for i in range(N):
        w = scale * (2.0 ** i)
        embs.append(jnp.sin(w * coords))
        embs.append(jnp.cos(w * coords))
    emb = jnp.concatenate(embs, axis=0)                      # (2*N*d, P)
    if additive:
        return values + emb[None]
    emb_b = jnp.broadcast_to(emb[None], (values.shape[0],) + emb.shape)
    return jnp.concatenate([values, emb_b], axis=1)


if __name__ == "__main__":
    key = jax.random.PRNGKey(0)

    # Small DiscretizedINR: 32x32 regular sampling grid -> P=1024 points, d=2.
    B, N_freq, d = 2, 4, 2
    H = W = 32
    P = H * W
    C = 2 * N_freq * d  # 16 channels so additive mode is valid

    ys, xs = jnp.meshgrid(
        jnp.linspace(-1.0, 1.0, H), jnp.linspace(-1.0, 1.0, W), indexing="ij")
    coords = jnp.stack([xs.reshape(-1), ys.reshape(-1)], axis=0).astype(jnp.float32)  # (2, P)

    values = jax.random.normal(key, (B, C, P), dtype=jnp.float32)

    # Pure-JAX references.
    ref_add = pos_enc_ref(coords, values, N=N_freq, additive=True, scale=1.0)
    ref_cat = pos_enc_ref(coords, values, N=N_freq, additive=False, scale=1.0)

    # additive=False (concat) path — small tile to exercise a multi-block grid.
    out_cat = jax.block_until_ready(
        pos_enc(coords, values, N=N_freq, additive=False, scale=1.0, tile_p=256))

    # additive=True path (values aliased to the output) — run last so the
    # values buffer is not needed afterwards.
    out_add = jax.block_until_ready(
        pos_enc(coords, values, N=N_freq, additive=True, scale=1.0))

    assert out_add.shape == (B, C, P)
    assert out_cat.shape == (B, C + 2 * N_freq * d, P)
    assert jnp.allclose(out_cat, ref_cat, atol=1e-5, rtol=1e-5)
    assert jnp.allclose(out_add, ref_add, atol=1e-5, rtol=1e-5)

    print("KERNEL_OK")
</pallas_src>

<mosaic_0001>
module attributes {stable_mosaic.version = 11 : i64} {
  func.func @_pos_enc_kernel(%arg0: i32, %arg1: memref<16x1xf32, #tpu.memory_space<vmem>>, %arg2: memref<16x1xf32, #tpu.memory_space<vmem>>, %arg3: memref<2x256xf32, #tpu.memory_space<vmem>>, %arg4: memref<2x16x256xf32, #tpu.memory_space<vmem>>, %arg5: memref<2x32x256xf32, #tpu.memory_space<vmem>>) attributes {dimension_semantics = [#tpu.dimension_semantics<parallel>], iteration_bounds = array<i64: 4>, scalar_prefetch = 0 : i64, scratch_operands = 0 : i64, tpu.core_type = #tpu.core_type<tc>, window_params = [{pipeline_mode = #tpu.pipeline_mode<synchronous>, transform_indices = @transform_0, window_bounds = array<i64: 16, 1>}, {pipeline_mode = #tpu.pipeline_mode<synchronous>, transform_indices = @transform_1, window_bounds = array<i64: 16, 1>}, {transform_indices = @transform_2, window_bounds = array<i64: 2, 256>}, {transform_indices = @transform_3, window_bounds = array<i64: 2, 16, 256>}, {transform_indices = @transform_4, window_bounds = array<i64: 2, 32, 256>}]} {
    %c0 = arith.constant 0 : index
    %c0_0 = arith.constant 0 : index
    %0 = vector.load %arg3[%c0, %c0_0] : memref<2x256xf32, #tpu.memory_space<vmem>>, vector<2x256xf32>
    %1 = tpu.concatenate %0, %0, %0, %0, %0, %0, %0, %0 in 0 : vector<2x256xf32>, vector<2x256xf32>, vector<2x256xf32>, vector<2x256xf32>, vector<2x256xf32>, vector<2x256xf32>, vector<2x256xf32>, vector<2x256xf32> -> vector<16x256xf32>
    %c0_1 = arith.constant 0 : index
    %c0_2 = arith.constant 0 : index
    %2 = vector.load %arg1[%c0_1, %c0_2] : memref<16x1xf32, #tpu.memory_space<vmem>>, vector<16x1xf32>
    %3 = vector.broadcast %2 : vector<16x1xf32> to vector<16x256xf32>
    %4 = arith.mulf %1, %3 : vector<16x256xf32>
    %c0_3 = arith.constant 0 : index
    %c0_4 = arith.constant 0 : index
    %5 = vector.load %arg2[%c0_3, %c0_4] : memref<16x1xf32, #tpu.memory_space<vmem>>, vector<16x1xf32>
    %6 = vector.broadcast %5 : vector<16x1xf32> to vector<16x256xf32>
    %7 = arith.addf %4, %6 : vector<16x256xf32>
    %8 = math.sin %7 : vector<16x256xf32>
    %c0_5 = arith.constant 0 : index
    %c0_6 = arith.constant 0 : index
    %c0_7 = arith.constant 0 : index
    %9 = vector.load %arg4[%c0_5, %c0_6, %c0_7] : memref<2x16x256xf32, #tpu.memory_space<vmem>>, vector<2x16x256xf32>
    %c0_8 = arith.constant 0 : index
    %c0_9 = arith.constant 0 : index
    %c0_10 = arith.constant 0 : index
    %10 = vector.load %arg5[%c0_8, %c0_9, %c0_10] : memref<2x32x256xf32, #tpu.memory_space<vmem>>, vector<2x16x256xf32>
    tpu.vector_store %arg5[%c0_8, %c0_9, %c0_10], %9 {strides = array<i32>} : memref<2x32x256xf32, #tpu.memory_space<vmem>>, vector<2x16x256xf32>,
    %c0_11 = arith.constant 0 : index
    %c16 = arith.constant 16 : index
    %c0_12 = arith.constant 0 : index
    %11 = vector.load %arg5[%c0_11, %c16, %c0_12] : memref<2x32x256xf32, #tpu.memory_space<vmem>>, vector<1x16x256xf32>
    %12 = vector.shape_cast %11 : vector<1x16x256xf32> to vector<16x256xf32>
    %13 = vector.shape_cast %8 : vector<16x256xf32> to vector<1x16x256xf32>
    tpu.vector_store %arg5[%c0_11, %c16, %c0_12], %13 {strides = array<i32>} : memref<2x32x256xf32, #tpu.memory_space<vmem>>, vector<1x16x256xf32>,
    %c1 = arith.constant 1 : index
    %c16_13 = arith.constant 16 : index
    %c0_14 = arith.constant 0 : index
    %14 = vector.load %arg5[%c1, %c16_13, %c0_14] : memref<2x32x256xf32, #tpu.memory_space<vmem>>, vector<1x16x256xf32>
    %15 = vector.shape_cast %14 : vector<1x16x256xf32> to vector<16x256xf32>
    %16 = vector.shape_cast %8 : vector<16x256xf32> to vector<1x16x256xf32>
    tpu.vector_store %arg5[%c1, %c16_13, %c0_14], %16 {strides = array<i32>} : memref<2x32x256xf32, #tpu.memory_space<vmem>>, vector<1x16x256xf32>,
    return
  }
  func.func @transform_0(%arg0: i32) -> (i32, i32) {
    %c0_i32 = arith.constant 0 : i32
    %c0_i32_0 = arith.constant 0 : i32
    %c0_i32_1 = arith.constant 0 : i32
    return %c0_i32, %c0_i32_0 : i32, i32
  }
  func.func @transform_1(%arg0: i32) -> (i32, i32) {
    %c0_i32 = arith.constant 0 : i32
    %c0_i32_0 = arith.constant 0 : i32
    %c0_i32_1 = arith.constant 0 : i32
    return %c0_i32, %c0_i32_0 : i32, i32
  }
  func.func @transform_2(%arg0: i32) -> (i32, i32) {
    %c0_i32 = arith.constant 0 : i32
    %c0_i32_0 = arith.constant 0 : i32
    return %c0_i32, %arg0 : i32, i32
  }
  func.func @transform_3(%arg0: i32) -> (i32, i32, i32) {
    %c0_i32 = arith.constant 0 : i32
    %c0_i32_0 = arith.constant 0 : i32
    %c0_i32_1 = arith.constant 0 : i32
    return %c0_i32, %c0_i32_0, %arg0 : i32, i32, i32
  }
  func.func @transform_4(%arg0: i32) -> (i32, i32, i32) {
    %c0_i32 = arith.constant 0 : i32
    %c0_i32_0 = arith.constant 0 : i32
    %c0_i32_1 = arith.constant 0 : i32
    return %c0_i32, %c0_i32_0, %arg0 : i32, i32, i32
  }
}

</mosaic_0001>

<bundles_post_ra>
// kernel: tpu_custom_call.1
= control target key start
LH: loop header
LB: loop body
LE: loop exit
PB: predicated region body
PF: predicated region fallthrough
CT: control target
= control target key end

     0   :  { %9 = vsyncpa [#allocation3], 0  ;;  %s1924_s0 = inlined_call_operand.vmem [shape: f32[16,1], index: 0, kind: input, shape index: {}]   ;;  %s1925_s1 = inlined_call_operand.vmem [shape: f32[16,1], index: 1, kind: input, shape index: {}]   ;;  %s1926_s2 = inlined_call_operand.vmem [shape: f32[2,1024], index: 2, kind: input, shape index: {}]   ;;  %s1927_s3 = inlined_call_operand.hbm [shape: f32[2,16,1024], index: 3, kind: input, shape index: {}]   ;;  %s1928_s4 = inlined_call_operand.hbm [shape: f32[2,32,1024], index: 4, kind: output, shape index: {}]  }
   0x1   :  { %11 = vsyncpa [#allocation3 + $0x1], 0 }
   0x2   :  { %12 = vsyncpa [#allocation4], 0 }
   0x3   :  { %14 = vsyncpa [#allocation4 + $0x1], 0  ;;  %s1314_s15 = smov 0   ;;  %s1316_s16 = smov 0  }
   0x4   :  { %s1318_s17 = smov 0   ;;  %s1320_s18 = smov 0  }
   0x5 LB: > { %s1335_s19 = sadd.s32 4294967295, %s1274_s18   ;;  %s1083_s20 = sadd.s32 4294967294, %s1274_s18   ;;  %s1274_s18 = sphi %s1320_s18, %s1943_s18   ;;  %s1270_s17 = sphi %s1318_s17, %s1942_s17   ;;  %s1266_s16 = sphi %s1316_s16, %s1941_s16   ;;  %s1262_s15 = sphi %s1314_s15, %s1940_s15  }
   0x6   : > { %s1339_s21 = sadd.s32 1, %s1274_s18   ;;  %s95_s22 = sadd.s32 1, %s1270_s17 }
   0x7   : > { %s92_s23 = ssub.s32 %s1274_s18, %s1339_s21  ;;  %p102_p0 = scmp.ne.s32.totalorder %s1270_s17, %s1266_s16 }
   0x8   : > { %p93_p1 = scmp.eq.s32.totalorder %s92_s23, 0  ;;  %p103_p2 = scmp.eq.s32.totalorder %s1274_s18, 0 }
   0x9   : > { %p108_p3 = scmp.ne.s32.totalorder %s1266_s16, %s1262_s15  ;;  %p109_p4 = scmp.eq.s32.totalorder %s1335_s19, 0 }
   0xa   : > { %s1351_s24 = scalar_select %p93_p1, %s1270_s17, %s95_s22  }
   0xb   : > { %p1353_p5 = por %p103_p2, %p102_p0  ;;  %p1357_p6 = por %p109_p4, %p108_p3 }
   0xc   : > { %p132_p7 = scmp.eq.s32.totalorder %s1335_s19, 3  ;;  %p138_p8 = scmp.eq.s32.totalorder %s1083_s20, 3 }
   0xd   : > { %p1129_p9 = scmp.lt.s32.totalorder %s1274_s18, 4  ;;  %s173_s29 = sand.u32 1, %s1270_s17  }
   0xe   : > { %p1363_p10 = por %p132_p7, %p102_p0  ;;  %p1367_p11 = por %p138_p8, %p108_p3 }
   0xf   : > { %s1115_s30 = sshll.u32 %s1274_s18, 4  ;;  %s1086_s5 = sshll.u32 %s173_s29, 6 }
  0x10   : > { %s182_s8 = scalar_lea.hbm %s1927_s3, %s1115_s30  ;;  %s177_s10 = scalar_lea.vmem [#allocation2], %s1086_s5 }
  0x11   : > { %s183_s9 = sshll.u32 %s182_s8, 4  ;;  %s185_s11 = sshll.u32 %s177_s10, 4  ;;  %s184_s9 = int_to_ptr.hbm [resolvable:$true] %s183_s9  ;;  %s186_s11 = int_to_ptr.vmem [resolvable:$true] %s185_s11 }
  0x12   : > { %p1378_p12 = pnand %p1129_p9, %p1353_p5  ;;  %p1089_p13 = scmp.ge.s32.totalorder %s1274_s18, 1 }
  0x13   : > { %s174_s13 = scalar_lea.sflag [#allocation3], %s173_s29  ;;  %s1178_s14 = sshra.s32 %s184_s9, 4  ;;  %s1179_s14 = int_to_ptr.hbm [resolvable:$true] %s1178_s14 }
  0x14   : > { %s1180_s20 = scalar_lea.hbm %s1179_s14, 64  ;;  %p1182_p1 = pneg %p1378_p12 }
  0x15   : > { %p1181_p0 = scmp.ne.s32.totalorder %s1179_s14, %s1180_s20  ;;  %s1185_s30 = scalar_lea.hbm %s1927_s3, 256 }
  0x16   : > { %p1186_p4 = scmp.lt.s32.totalorder %s1179_s14, %s1927_s3  ;;  %p1187_p5 = scmp.lt.s32.totalorder %s1185_s30, %s1180_s20 }
  0x17   : > { %p1183_p2 = pnand %p1182_p1, %p1181_p0 }
  0x18   : > { %p1188_p7 = por %p1187_p5, %p1186_p4 }
  0x19   : > { %p1184_p3 = pneg %p1183_p2 }
  0x1b   : > { %p1189_p8 = pnand %p1188_p7, %p1184_p3 }
  0x1d   : > { %1192 = shalt.err (!%p1189_p8)
}
  0x1e   : > { %s1276_s29 = smov 1024   ;;  %s1277_s6 = smov 256  }
  0x1f   : > { %s1278_s7 = smov 16   ;;  %p193_p9 = scmp.lt.s32.totalorder %s1274_s18, 5 }
  0x20   : > { %1124 = dma.hbm_to_vmem [thread:$0]  (!%p1378_p12), %s184_s9, 1024, %s186_s11, %s174_s13, %s1276_s29, %s1277_s6, %s1278_s7  }
  0x21   : > { %p194_p0 = pnand %p1089_p13, %p193_p9 }
  0x22   : > { %s1397_s8 = sand.u32 (!%p194_p0), 1, %s1266_s16  }
  0x23   : > { %197 = sbr.rel (%p194_p0) target bundleno = 360 (0x168), region = 36  ;;  %s1090_s10 = sshll.u32 (!%p194_p0), %s1397_s8, 6 }
  0x24   : > { %s200_s14 = scalar_lea.sflag (!%p194_p0), [#allocation3], %s1397_s8  ;;  %s1401_s20 = scalar_lea.vmem (!%p194_p0), [#allocation2], %s1090_s10 }
  0x28   : > { %1253 = dma.done.wait (%p1357_p6), %s200_s14, 1024  }
  0x29   : > { %1255 = vsyncadd (%p1357_p6), %s200_s14, 4294966272  ;;  %v1279_v0 = vmov 0   ;;  %v321_v1 = vld [vmem:[%s1925_s1] sm:$0xff]  ;;  %v322_v3 = vld [vmem:[%s1925_s1 + $0x8] sm:$0xff]  ;;  %s1092_s25 = sshll.u32 %s1335_s19, 1  ;;  %vm290_vm0 = vcmask 1041408  }
  0x2a   : > { %1177 = vset.pattern.permute.xlu1 %v1279_v0  ;;  %1176 = vset.pattern.permute.xlu0 %v1279_v0  ;;  %v305_v2 = vld [vmem:[%s1924_s0] sm:$0xff]  ;;  %v306_v4 = vld [vmem:[%s1924_s0 + $0x8] sm:$0xff]  ;;  %p235_p6 = scmp.lt.s32.totalorder %s1092_s25, 7  ;;  %vm293_vm1 = vcmask 1043456   ;;  %vm296_vm2 = vcmask 1045504   ;;  %s1091_s10 = sshll.u32 %s1397_s8, 7 }
  0x2b   : > { %325 = vperm.xlu1 %1177, %v321_v1   ;;  %309 = vperm.xlu0 %1176, %v305_v2   ;;  %s1756_s14 = scalar_lea.vmem [#allocation5], %s1091_s10 }
  0x2c   : > { %s1945_s25 = smov (!%p235_p6, %s1092_s25), 7  ;;  %s995_s13 = sshll.u32 %s1756_s14, 4  ;;  %s996_s13 = int_to_ptr.vmem [resolvable:$true] %s995_s13 }
  0x2d   : > { %s1093_s5 = sshll.u32 %s1945_s25, 1 }
  0x2e   : > { %s238_s7 = scalar_lea.vmem %s1926_s2, %s1093_s5  ;;  %s1228_s5 = scalar_lea.hbm %s1928_s4, 512 }
  0x2f   : > { %v242_v5 = vld [vmem:[%s238_s7] sm:$0xf] }
  0x30   : > { %244 = vst [vmem:[#allocation1] ss:$4 sm:$0xff] %v242_v5 }
  0x33   : > { %330 = vperm.xlu1 %1177, %v322_v3   ;;  %314 = vperm.xlu0 %1176, %v306_v4  }
  0x37   : > { %v245_v6 = vld.sshfl [vmem:[#allocation1] sm:$0xff pattern:$0x73625140]  ;;  %v246_v7 = vld.sshfl [vmem:[#allocation1 + $0x8] sm:$0xff pattern:$0x73625140] }
  0x38   : > { %250 = vst [vmem:[#allocation1 + $0x1] ss:$4 sm:$0xff] %v242_v5 }
  0x3f   : > { %v251_v8 = vld.sshfl [vmem:[#allocation1] sm:$0xff pattern:$0x73625140]  ;;  %v252_v9 = vld.sshfl [vmem:[#allocation1 + $0x8] sm:$0xff pattern:$0x73625140] }
  0x40   : > { %256 = vst [vmem:[#allocation1 + $0x2] ss:$4 sm:$0xff] %v242_v5  ;;  %v291_v14 = vsel %vm290_vm0, %v245_v6, %v251_v8  ;;  %v292_v15 = vsel %vm290_vm0, %v246_v7, %v252_v9  ;;  %v1281_v7 = vmov 2475754826  }
  0x47   : > { %v257_v10 = vld.sshfl [vmem:[#allocation1] sm:$0xff pattern:$0x73625140]  ;;  %v258_v11 = vld.sshfl [vmem:[#allocation1 + $0x8] sm:$0xff pattern:$0x73625140] }
  0x48   : > { %262 = vst [vmem:[#allocation1 + $0x3] ss:$4 sm:$0xff] %v242_v5  ;;  %v294_v16 = vsel %vm293_vm1, %v291_v14, %v257_v10  ;;  %v295_v17 = vsel %vm293_vm1, %v292_v15, %v258_v11  ;;  %v1282_v11 = vmov 2131351028   ;;  %v1283_v14 = vmov 2102212464  }
  0x4f   : > { %v263_v12 = vld.sshfl [vmem:[#allocation1] sm:$0xff pattern:$0x73625140]  ;;  %v264_v13 = vld.sshfl [vmem:[#allocation1 + $0x8] sm:$0xff pattern:$0x73625140] }
  0x50   : > { %267 = vst [vmem:[#allocation1] ss:$4 sm:$0xff] %v242_v5  ;;  %v298_v18 = vsel %vm296_vm2, %v295_v17, %v264_v13  ;;  %v297_v30 = vsel %vm296_vm2, %v294_v16, %v263_v12  ;;  %v1284_v17 = vmov 920167782  }
  0x57   : > { %v268_v19 = vld.sshfl [vmem:[#allocation1] sm:$0xff pattern:$0x73625140]  ;;  %v269_v20 = vld.sshfl [vmem:[#allocation1 + $0x8] sm:$0xff pattern:$0x73625140] }
  0x58   : > { %273 = vst [vmem:[#allocation1 + $0x1] ss:$4 sm:$0xff] %v242_v5 }
  0x5f   : > { %v274_v21 = vld.sshfl [vmem:[#allocation1] sm:$0xff pattern:$0x73625140]  ;;  %v275_v22 = vld.sshfl [vmem:[#allocation1 + $0x8] sm:$0xff pattern:$0x73625140] }
  0x60   : > { %279 = vst [vmem:[#allocation1 + $0x2] ss:$4 sm:$0xff] %v242_v5  ;;  %v299_v25 = vsel %vm290_vm0, %v268_v19, %v274_v21  ;;  %v300_v26 = vsel %vm290_vm0, %v269_v20, %v275_v22  ;;  %v1285_v20 = vmov 1326507024  }
  0x67   : > { %v280_v23 = vld.sshfl [vmem:[#allocation1] sm:$0xff pattern:$0x73625140]  ;;  %v281_v24 = vld.sshfl [vmem:[#allocation1 + $0x8] sm:$0xff pattern:$0x73625140] }
  0x68   : > { %285 = vst [vmem:[#allocation1 + $0x3] ss:$4 sm:$0xff] %v242_v5  ;;  %v301_v28 = vsel %vm293_vm1, %v299_v25, %v280_v23  ;;  %v302_v29 = vsel %vm293_vm1, %v300_v26, %v281_v24  ;;  %v1280_v5 = vmov 683565275  }
  0x6f   : > { %v287_v27 = vld.sshfl [vmem:[#allocation1 + $0x8] sm:$0xff pattern:$0x73625140]  ;;  %v286_v42 = vld.sshfl [vmem:[#allocation1] sm:$0xff pattern:$0x73625140] }
  0x70   : > { %v1436_v31 = vsel %vm296_vm2, %v302_v29, %v287_v27  ;;  %v303_v50 = vsel %vm296_vm2, %v301_v28, %v286_v42 }
  0x9d   : > { %v310_v32 = vpop.permute.xlu0 %309  ;;  %v326_v35 = vpop.permute.xlu1 %325 }
  0x9e   : > { %v317_v33 = vmul.f32 %v310_v32, %v297_v30  ;;  %v318_v34 = vmul.f32 %v310_v32, %v298_v18 }
  0xa0   : > { %v1438_v36 = vadd.f32 %v326_v35, %v317_v33  ;;  %v1440_v37 = vadd.f32 %v326_v35, %v318_v34 }
  0xa2   : > { %v337_v38 = vand.u32 2147483647, %v1438_v36  ;;  %v340_v39 = vand.u32 2139095040, %v1438_v36  ;;  %v492_v40 = vand.u32 2147483647, %v1440_v37  ;;  %v495_v41 = vand.u32 2139095040, %v1440_v37 }
  0xa4   : > { %v341_v43 = vshrl.u32 %v340_v39, 23  ;;  %v344_v44 = vand.u32 8388607, %v337_v38  ;;  %v496_v45 = vshrl.u32 %v495_v41, 23  ;;  %v499_v46 = vand.u32 8388607, %v492_v40 }
  0xa5   : > { %v1450_v49 = vpop.permute.xlu0 %314  ;;  %v1458_v61 = vpop.permute.xlu1 %330 }
  0xa6   : > { %v1094_v47 = vadd.s32 4294967169, %v341_v43  ;;  %v345_v48 = vor.u32 8388608, %v344_v44  ;;  %v1097_v51 = vadd.s32 4294967169, %v496_v45  ;;  %v500_v52 = vor.u32 8388608, %v499_v46 }
  0xa7   : > { %v319_v55 = vmul.f32 %v1450_v49, %v303_v50 }
  0xa8   : > { %v347_v53 = vadd.s32 1, %v1094_v47  ;;  %v502_v54 = vadd.s32 1, %v1097_v51  ;;  %v1454_v56 = vshll.u32 %v345_v48, 8  ;;  %v1456_v58 = vshll.u32 %v500_v52, 8 }
  0xa9   : > { %v1461_v62 = vadd.f32 %v1458_v61, %v319_v55 }
  0xaa   : > { %vm348_vm3 = vcmp.gt.s32.totalorder %v347_v53, 0  ;;  %vm503_vm4 = vcmp.gt.s32.totalorder %v502_v54, 0  ;;  %v1464_v1 = vand.u32 65535, %v1454_v56  ;;  %v1467_v2 = vshrl.u32 %v1454_v56, 16 }
  0xab   : > { %v349_v57 = vsel %vm348_vm3, %v347_v53, 0  ;;  %v504_v60 = vsel %vm503_vm4, %v502_v54, 0  ;;  %v1476_v9 = vand.u32 65535, %v1456_v58  ;;  %vm339_vm4 = vcmp.lt.s32.totalorder %v1438_v36, 0 }
  0xac   : > { %v351_v59 = vand.u32 31, %v349_v57  ;;  %v1469_v3 = vand.u32 31, %v504_v60  ;;  %v1471_v4 = vshrl.u32 %v349_v57, 5  ;;  %v1518_v54 = vshrl.u32 %v504_v60, 5 }
  0xae   : > { %v352_v63 = vsub.s32 32, %v351_v59  ;;  %v354_v6 = vshll.u32 %v1280_v5, %v351_v59  ;;  %v357_v8 = vshll.u32 %v1281_v7, %v351_v59  ;;  %v360_v13 = vshll.u32 %v1282_v11, %v351_v59 }
  0xaf   : > { %v363_v16 = vshll.u32 %v1283_v14, %v351_v59  ;;  %v366_v19 = vshll.u32 %v1284_v17, %v351_v59  ;;  %v1487_v25 = vsub.s32 32, %v1469_v3  ;;  %vm369_vm5 = vcmp.lt.s32.totalorder %v1471_v4, 1 }
  0xb0   : > { %v355_v10 = vshrl.u32 %v1281_v7, %v352_v63  ;;  %v358_v12 = vshrl.u32 %v1282_v11, %v352_v63  ;;  %v361_v15 = vshrl.u32 %v1283_v14, %v352_v63  ;;  %v364_v18 = vshrl.u32 %v1284_v17, %v352_v63 }
  0xb1   : > { %v367_v21 = vshrl.u32 %v1285_v20, %v352_v63  ;;  %vm370_vm6 = vcmp.lt.s32.totalorder %v1471_v4, 2  ;;  %v353_v28 = vshrl.u32 %v1280_v5, %v352_v63  ;;  %vm372_vm7 = vcmp.lt.s32.totalorder %v1471_v4, 4 }
  0xb2   : > { %v356_v22 = vor.u32 %v355_v10, %v354_v6  ;;  %v359_v23 = vor.u32 %v358_v12, %v357_v8  ;;  %v362_v24 = vor.u32 %v361_v15, %v360_v13  ;;  %v365_v26 = vor.u32 %v364_v18, %v363_v16 }
  0xb3   : > { %v368_v27 = vor.u32 %v367_v21, %v366_v19  ;;  %vm371_vm8 = vcmp.lt.s32.totalorder %v1471_v4, 3  ;;  %v509_v34 = vshll.u32 %v1280_v5, %v1469_v3  ;;  %v510_v42 = vshrl.u32 %v1281_v7, %v1487_v25 }
  0xb4   : > { %v377_v29 = vsel %vm369_vm5, %v356_v22, %v359_v23  ;;  %v381_v30 = vsel %vm369_vm5, %v359_v23, %v362_v24  ;;  %v378_v32 = vsel %vm372_vm7, %v365_v26, 920167782  ;;  %v374_v35 = vsel %vm372_vm7, %v362_v24, 2102212464 }
  0xb5   : > { %v382_v33 = vsel %vm372_vm7, %v368_v27, 1326507024  ;;  %v379_v39 = vsel %vm371_vm8, %v362_v24, %v378_v32  ;;  %v512_v45 = vshll.u32 %v1281_v7, %v1469_v3  ;;  %v513_v46 = vshrl.u32 %v1282_v11, %v1487_v25 }
  0xb6   : > { %v383_v41 = vsel %vm371_vm8, %v365_v26, %v382_v33  ;;  %v380_v43 = vsel %vm370_vm6, %v377_v29, %v379_v39  ;;  %v373_v52 = vsel %vm369_vm5, %v353_v28, %v356_v22  ;;  %v375_v53 = vsel %vm371_vm8, %v359_v23, %v374_v35 }
  0xb7   : > { %v384_v44 = vsel %vm370_vm6, %v381_v30, %v383_v41  ;;  %v410_v50 = vand.u32 65535, %v380_v43  ;;  %v411_v51 = vshrl.u32 %v380_v43, 16  ;;  %v1520_v55 = vor.u32 %v510_v42, %v509_v34 }
  0xb8   : > { %v388_v47 = vand.u32 65535, %v384_v44  ;;  %v389_v48 = vshrl.u32 %v384_v44, 16  ;;  %v1524_v63 = vor.u32 %v513_v46, %v512_v45  ;;  %v516_v6 = vshrl.u32 %v1283_v14, %v1487_v25 }
  0xb9   : > { %v413_v10 = vmul.u32 %v411_v51, %v1464_v1  ;;  %v414_v12 = vmul.u32 %v410_v50, %v1467_v2  ;;  %v515_v60 = vshll.u32 %v1282_v11, %v1469_v3  ;;  %v412_v16 = vmul.u32 %v410_v50, %v1464_v1 }
  0xba   : > { %v391_v57 = vmul.u32 %v389_v48, %v1464_v1  ;;  %v392_v59 = vmul.u32 %v388_v47, %v1467_v2  ;;  %v390_v8 = vmul.u32 %v388_v47, %v1464_v1  ;;  %v393_v13 = vmul.u32 %v389_v48, %v1467_v2 }
  0xbb   : > { %v415_v18 = vmul.u32 %v411_v51, %v1467_v2  ;;  %v416_v23 = vshll.u32 %v413_v10, 16  ;;  %v418_v26 = vshll.u32 %v414_v12, 16  ;;  %v517_v27 = vor.u32 %v516_v6, %v515_v60 }
  0xbc   : > { %v394_v15 = vshll.u32 %v391_v57, 16  ;;  %v395_v19 = vshrl.u32 %v391_v57, 16  ;;  %v396_v21 = vshll.u32 %v392_v59, 16  ;;  %v397_v22 = vshrl.u32 %v392_v59, 16 }
  0xbd   : > { %vm420_vm10 = vc.u32 %v412_v16, %v416_v23  ;;  %v422_v29 = vadd.s32 %v416_v23, %v412_v16  ;;  %v519_v30 = vshrl.u32 %v1284_v17, %v1487_v25  ;;  %v518_v2 = vshll.u32 %v1283_v14, %v1469_v3 }
  0xbe   : > { %vm398_vm9 = vc.u32 %v390_v8, %v394_v15  ;;  %v400_v24 = vadd.s32 %v394_v15, %v390_v8  ;;  %v421_v1 = vsel %vm420_vm10, 1, %v1279_v0  ;;  %v521_v35 = vshll.u32 %v1284_v17, %v1469_v3 }
  0xbf   : > { %v399_v28 = vsel %vm398_vm9, 1, %v1279_v0  ;;  %v423_v34 = vadd.s32 %v421_v1, %v415_v18  ;;  %vm424_vm12 = vc.u32 %v422_v29, %v418_v26  ;;  %v520_v42 = vor.u32 %v519_v30, %v518_v2 }
  0xc0   : > { %v401_v32 = vadd.s32 %v399_v28, %v393_v13  ;;  %vm402_vm11 = vc.u32 %v400_v24, %v396_v21  ;;  %v425_v41 = vsel %vm424_vm12, 1, %v1279_v0  ;;  %v522_v43 = vshrl.u32 %v1285_v20, %v1487_v25 }
  0xc1   : > { %v403_v33 = vsel %vm402_vm11, 1, %v1279_v0  ;;  %v417_v44 = vshrl.u32 %v413_v10, 16  ;;  %v419_v45 = vshrl.u32 %v414_v12, 16  ;;  %v1548_v46 = vadd.s32 %v422_v29, %v418_v26 }
  0xc2   : > { %v405_v39 = vadd.s32 %v403_v33, %v401_v32  ;;  %v427_v47 = vadd.s32 %v425_v41, %v423_v34  ;;  %v523_v50 = vor.u32 %v522_v43, %v521_v35  ;;  %vm524_vm13 = vcmp.lt.s32.totalorder %v1518_v54, 1 }
  0xc3   : > { %vm527_vm14 = vcmp.lt.s32.totalorder %v1518_v54, 4  ;;  %vm526_vm15 = vcmp.lt.s32.totalorder %v1518_v54, 3  ;;  %v532_v3 = vsel %vm524_vm13, %v1520_v55, %v1524_v63  ;;  %vm525_vm0 = vcmp.lt.s32.totalorder %v1518_v54, 2 }
  0xc4   : > { %v406_v48 = vadd.s32 %v405_v39, %v395_v19  ;;  %v428_v51 = vadd.s32 %v427_v47, %v417_v44  ;;  %v533_v57 = vsel %vm527_vm14, %v520_v42, 920167782  ;;  %v536_v8 = vsel %vm524_vm13, %v1524_v63, %v517_v27 }
  0xc5   : > { %v534_v6 = vsel %vm526_vm15, %v517_v27, %v533_v57  ;;  %v376_v10 = vsel %vm370_vm6, %v373_v52, %v375_v53  ;;  %v537_v13 = vsel %vm527_vm14, %v523_v50, 1326507024  ;;  %v542_v16 = vshrl.u32 %v1456_v58, 16 }
  0xc6   : > { %v1559_v59 = vadd.s32 %v406_v48, %v397_v22  ;;  %v429_v12 = vadd.s32 %v428_v51, %v419_v45  ;;  %v535_v60 = vsel %vm525_vm0, %v532_v3, %v534_v6  ;;  %v538_v15 = vsel %vm526_vm15, %v520_v42, %v537_v13 }
  0xc7   : > { %v565_v18 = vand.u32 65535, %v535_v60  ;;  %v539_v4 = vsel %vm525_vm0, %v536_v8, %v538_v15  ;;  %v566_v52 = vshrl.u32 %v535_v60, 16  ;;  %v650_v53 = vand.u32 2139095040, %v1461_v62 }
  0xc8   : > { %vm432_vm1 = vc.u32 %v1559_v59, %v1548_v46  ;;  %v433_v19 = vadd.s32 1, %v429_v12  ;;  %v430_v21 = vmul.u32 %v1454_v56, %v376_v10  ;;  %v543_v22 = vand.u32 65535, %v539_v4 }
  0xc9   : > { %v544_v23 = vshrl.u32 %v539_v4, 16  ;;  %v508_v26 = vshrl.u32 %v1280_v5, %v1487_v25  ;;  %v568_v28 = vmul.u32 %v566_v52, %v1476_v9  ;;  %v569_v29 = vmul.u32 %v565_v18, %v542_v16 }
  0xca   : > { %v434_v24 = vsel %vm432_vm1, %v433_v19, %v429_v12  ;;  %v529_v32 = vsel %vm527_vm14, %v517_v27, 2102212464  ;;  %v547_v2 = vmul.u32 %v543_v22, %v542_v16  ;;  %v567_v33 = vmul.u32 %v565_v18, %v1476_v9 }
  0xcb   : > { %v435_v30 = vadd.s32 %v434_v24, %v430_v21  ;;  %v546_v1 = vmul.u32 %v544_v23, %v1476_v9  ;;  %v570_v34 = vmul.u32 %v566_v52, %v542_v16  ;;  %v571_v56 = vshll.u32 %v568_v28, 16 }
  0xcc   : > { %v651_v35 = vshrl.u32 %v650_v53, 23  ;;  %v545_v41 = vmul.u32 %v543_v22, %v1476_v9  ;;  %v548_v42 = vmul.u32 %v544_v23, %v542_v16  ;;  %v551_v43 = vshll.u32 %v547_v2, 16 }
  0xcd   : > { %v436_v39 = vadd.s32 536870912, %v435_v30  ;;  %v549_v25 = vshll.u32 %v546_v1, 16  ;;  %v573_v44 = vshll.u32 %v569_v29, 16  ;;  %vm575_vm2 = vc.u32 %v567_v33, %v571_v56 }
  0xce   : > { %v577_v45 = vadd.s32 %v571_v56, %v567_v33  ;;  %v576_v48 = vsel %vm575_vm2, 1, %v1279_v0  ;;  %v528_v9 = vsel %vm524_vm13, %v508_v26, %v1520_v55  ;;  %v530_v6 = vsel %vm526_vm15, %v1524_v63, %v529_v32 }
  0xcf   : > { %v437_v47 = vshrl.u32 %v436_v39, 30  ;;  %vm553_vm3 = vc.u32 %v545_v41, %v549_v25  ;;  %v555_v27 = vadd.s32 %v549_v25, %v545_v41  ;;  %v578_v51 = vadd.s32 %v576_v48, %v570_v34 }
  0xd0   : > { %v554_v50 = vsel %vm553_vm3, 1, %v1279_v0  ;;  %vm579_vm5 = vc.u32 %v577_v45, %v573_v44  ;;  %v1100_v12 = vadd.s32 4294967169, %v651_v35  ;;  %v550_v13 = vshrl.u32 %v546_v1, 16 }
  0xd1   : > { %v438_v3 = vshll.u32 %v437_v47, 30  ;;  %v556_v57 = vadd.s32 %v554_v50, %v548_v42  ;;  %vm557_vm6 = vc.u32 %v555_v27, %v551_v43  ;;  %v580_v10 = vsel %vm579_vm5, 1, %v1279_v0 }
  0xd2   : > { %v558_v8 = vsel %vm557_vm6, 1, %v1279_v0  ;;  %v582_v16 = vadd.s32 %v580_v10, %v578_v51  ;;  %v461_v18 = vsub.s32 4, %v437_v47  ;;  %v572_v19 = vshrl.u32 %v568_v28, 16 }
  0xd3   : > { %v439_v60 = vsub.s32 %v435_v30, %v438_v3  ;;  %v560_v15 = vadd.s32 %v558_v8, %v556_v57  ;;  %v647_v4 = vand.u32 2147483647, %v1461_v62  ;;  %v657_v55 = vadd.s32 1, %v1100_v12 }
  0xd4   : > { %v552_v53 = vshrl.u32 %v547_v2, 16  ;;  %v531_v63 = vsel %vm525_vm0, %v528_v9, %v530_v6  ;;  %v574_v22 = vshrl.u32 %v569_v29, 16  ;;  %v583_v23 = vadd.s32 %v582_v16, %v572_v19 }
  0xd5   : > { %vm440_vm7 = vcmp.lt.s32.totalorder %v439_v60, 0  ;;  %v441_v52 = vsub.s32 0, %v439_v60  ;;  %v561_v21 = vadd.s32 %v560_v15, %v550_v13  ;;  %vm658_vm8 = vcmp.gt.s32.totalorder %v657_v55, 0 }
  0xd6   : > { %v1606_v30 = vadd.s32 %v577_v45, %v573_v44  ;;  %v659_v32 = vsel %vm658_vm8, %v657_v55, 0  ;;  %v462_v1 = vsel %vm339_vm4, %v461_v18, %v437_v47  ;;  %v584_v33 = vadd.s32 %v583_v23, %v574_v22 }
  0xd7   : > { %v442_v24 = vsel %vm440_vm7, %v441_v52, %v439_v60  ;;  %v1604_v26 = vadd.s32 %v561_v21, %v552_v53  ;;  %v661_v34 = vand.u32 31, %v659_v32  ;;  %vm1612_vm9 = vcmp.le.f32.partialorder %v337_v38, 0.7853982 }
  0xd8   : > { %v443_v28 = vclz %v442_v24  ;;  %v588_v2 = vadd.s32 1, %v584_v33  ;;  %v431_v35 = vadd.s32 %v1548_v46, %v1559_v59  ;;  %v464_v39 = vsel %vm1612_vm9, 0, %v462_v1 }
  0xd9   : > { %vm587_vm10 = vc.u32 %v1604_v26, %v1606_v30  ;;  %v662_v56 = vsub.s32 32, %v661_v34  ;;  %v585_v41 = vmul.u32 %v1456_v58, %v531_v63  ;;  %v654_v38 = vand.u32 8388607, %v647_v4 }
  0xda   : > { %v1095_v29 = vadd.s32 4294967294, %v443_v28  ;;  %v589_v42 = vsel %vm587_vm10, %v588_v2, %v584_v33  ;;  %v1625_v25 = vshrl.u32 %v659_v32, 5  ;;  %v664_v43 = vshll.u32 %v1280_v5, %v661_v34 }
  0xdb   : > { %v590_v45 = vadd.s32 %v589_v42, %v585_v41  ;;  %v665_v47 = vshrl.u32 %v1281_v7, %v662_v56  ;;  %v668_v46 = vshrl.u32 %v1282_v11, %v662_v56  ;;  %v667_v48 = vshll.u32 %v1281_v7, %v661_v34 }
  0xdc   : > { %vm1096_vm11 = vcmp.lt.s32.totalorder %v1095_v29, 0  ;;  %v671_v58 = vshrl.u32 %v1283_v14, %v662_v56  ;;  %v670_v51 = vshll.u32 %v1282_v11, %v661_v34  ;;  %v673_v3 = vshll.u32 %v1283_v14, %v661_v34 }
  0xdd   : > { %v446_v44 = vsel %vm1096_vm11, 0, %v1095_v29  ;;  %v591_v50 = vadd.s32 536870912, %v590_v45  ;;  %v674_v9 = vshrl.u32 %v1284_v17, %v662_v56  ;;  %v677_v10 = vshrl.u32 %v1285_v20, %v662_v56 }
  0xde   : > { %v447_v59 = vsub.s32 32, %v446_v44  ;;  %v451_v27 = vsub.s32 4294967266, %v446_v44  ;;  %v448_v57 = vshll.u32 %v439_v60, %v446_v44  ;;  %v666_v13 = vor.u32 %v665_v47, %v664_v43 }
  0xdf   : > { %v1636_v12 = vshrl.u32 %v591_v50, 30  ;;  %v1638_v15 = vor.u32 %v668_v46, %v667_v48  ;;  %v675_v16 = vor.u32 %v674_v9, %v673_v3  ;;  %v672_v55 = vor.u32 %v671_v58, %v670_v51 }
  0xe0   : > { %v449_v6 = vshrl.u32 %v431_v35, %v447_v59  ;;  %v452_v8 = vadd.s32 127, %v451_v27  ;;  %v676_v52 = vshll.u32 %v1284_v17, %v661_v34  ;;  %v481_v53 = vadd.s32 3, %v464_v39 }
  0xe1   : > { %v593_v21 = vshll.u32 %v1636_v12, 30  ;;  %v320_v60 = vmul.f32 %v1450_v49, %v1436_v31  ;;  %v655_v63 = vor.u32 8388608, %v654_v38  ;;  %vm679_vm12 = vcmp.lt.s32.totalorder %v1625_v25, 1 }
  0xe2   : > { %v450_v18 = vor.u32 %v449_v6, %v448_v57  ;;  %v453_v19 = vshll.u32 %v452_v8, 23  ;;  %v678_v23 = vor.u32 %v677_v10, %v676_v52  ;;  %vm682_vm13 = vcmp.lt.s32.totalorder %v1625_v25, 4 }
  0xe3   : > { %v1646_v24 = vsub.s32 %v590_v45, %v593_v21  ;;  %vm681_vm14 = vcmp.lt.s32.totalorder %v1625_v25, 3  ;;  %v687_v32 = vsel %vm679_vm12, %v666_v13, %v1638_v15  ;;  %v688_v28 = vsel %vm682_vm13, %v675_v16, 920167782 }
  0xe4   : > { %v454_v22 = vor.u32 4788187, %v453_v19  ;;  %v457_v31 = vcvt.s32.f32 %v450_v18  ;;  %v689_v49 = vsel %vm681_vm14, %v672_v55, %v688_v28  ;;  %vm680_vm0 = vcmp.lt.s32.totalorder %v1625_v25, 2 }
  0xe5   : > { %vm595_vm15 = vcmp.lt.s32.totalorder %v1646_v24, 0  ;;  %v596_v33 = vsub.s32 0, %v1646_v24  ;;  %v1659_v34 = vshll.u32 %v655_v63, 8  ;;  %v1663_v2 = vsel %vm680_vm0, %v687_v32, %v689_v49 }
  0xe6   : > { %v455_v1 = vand.u32 2147483647, %v454_v22  ;;  %v691_v35 = vsel %vm679_vm12, %v1638_v15, %v672_v55  ;;  %v692_v39 = vsel %vm682_vm13, %v678_v23, 1326507024  ;;  %v1670_v41 = vand.u32 3, %v481_v53 }
  0xe7   : > { %v597_v38 = vsel %vm595_vm15, %v596_v33, %v1646_v24  ;;  %v1674_v42 = vadd.f32 %v1458_v61, %v320_v60  ;;  %v693_v43 = vsel %vm681_vm14, %v675_v16, %v692_v39  ;;  %v663_v47 = vshrl.u32 %v1280_v5, %v662_v56 }
  0xe8   : > { %v458_v29 = vmul.f32 %v457_v31, %v455_v1  ;;  %v598_v45 = vclz %v597_v38  ;;  %v694_v46 = vsel %vm680_vm0, %v691_v35, %v693_v43  ;;  %v696_v59 = vand.u32 65535, %v1659_v34 }
  0xe9   : > { %v697_v27 = vshrl.u32 %v1659_v34, 16  ;;  %v698_v48 = vand.u32 65535, %v694_v46  ;;  %v720_v58 = vand.u32 65535, %v1663_v2  ;;  %v699_v51 = vshrl.u32 %v694_v46, 16 }
  0xea   : > { %v459_v44 = vxor.u32 2147483648, %v458_v29  ;;  %v1098_v50 = vadd.s32 4294967294, %v598_v45  ;;  %v721_v3 = vshrl.u32 %v1663_v2, 16  ;;  %v586_v9 = vadd.s32 %v1606_v30, %v1604_v26 }
  0xeb   : > { %v616_v57 = vsub.s32 4, %v1636_v12  ;;  %v1695_v6 = vmul.u32 %v698_v48, %v697_v27  ;;  %v1701_v10 = vsel %vm679_vm12, %v663_v47, %v666_v13  ;;  %v701_v16 = vmul.u32 %v699_v51, %v696_v59 }
  0xec   : > { %v460_v61 = vsel %vm339_vm4, %v459_v44, %v458_v29  ;;  %vm1099_vm1 = vcmp.lt.s32.totalorder %v1098_v50, 0  ;;  %v684_v54 = vsel %vm682_vm13, %v672_v55, 2102212464  ;;  %v700_v19 = vmul.u32 %v698_v48, %v696_v59 }
  0xed   : > { %v1690_v56 = vsel %vm1612_vm9, %v1438_v36, %v460_v61  ;;  %v601_v18 = vsel %vm1099_vm1, 0, %v1098_v50  ;;  %v722_v52 = vmul.u32 %v720_v58, %v696_v59  ;;  %v723_v21 = vmul.u32 %v721_v3, %v696_v59 }
  0xee   : > { %v465_v8 = vmul.f32 %v1690_v56, %v1690_v56  ;;  %v602_v53 = vsub.s32 32, %v601_v18  ;;  %v606_v60 = vsub.s32 4294967266, %v601_v18  ;;  %v703_v63 = vmul.u32 %v699_v51, %v697_v27 }
  0xef   : > { %v704_v22 = vshll.u32 %v701_v16, 16  ;;  %v706_v23 = vshll.u32 %v1695_v6, 16  ;;  %v603_v13 = vshll.u32 %v1646_v24, %v601_v18  ;;  %v724_v55 = vmul.u32 %v720_v58, %v697_v27 }
  0xf0   : > { %v466_v26 = vmul.f32 -0.001358992, %v465_v8  ;;  %v473_v30 = vmul.f32 -0.00019511016, %v465_v8  ;;  %v604_v1 = vshrl.u32 %v586_v9, %v602_v53  ;;  %v607_v31 = vadd.s32 127, %v606_v60 }
  0xf1   : > { %vm708_vm2 = vc.u32 %v700_v19, %v704_v22  ;;  %v710_v49 = vadd.s32 %v704_v22, %v700_v19  ;;  %vm494_vm3 = vcmp.lt.s32.totalorder %v1440_v37, 0  ;;  %v726_v35 = vshll.u32 %v723_v21, 16 }
  0xf2   : > { %v467_v32 = vadd.f32 0.041655596, %v466_v26  ;;  %v474_v28 = vadd.f32 0.008332121, %v473_v30  ;;  %v709_v2 = vsel %vm708_vm2, 1, %v1279_v0  ;;  %v605_v39 = vor.u32 %v604_v1, %v603_v13 }
  0xf3   : > { %v608_v38 = vshll.u32 %v607_v31, 23  ;;  %v711_v43 = vadd.s32 %v709_v2, %v703_v63  ;;  %vm712_vm4 = vc.u32 %v710_v49, %v706_v23  ;;  %v705_v47 = vshrl.u32 %v701_v16, 16 }
  0xf4   : > { %v468_v33 = vmul.f32 %v467_v32, %v465_v8  ;;  %v475_v29 = vmul.f32 %v474_v28, %v465_v8  ;;  %v713_v24 = vsel %vm712_vm4, 1, %v1279_v0  ;;  %vm484_vm5 = vcmp.eq.s32.totalorder %v1670_v41, 0 }
  0xf5   : > { %vm1713_vm6 = vcmp.le.f32.partialorder %v492_v40, 0.7853982  ;;  %v609_v59 = vor.u32 4788187, %v608_v38  ;;  %v715_v48 = vadd.s32 %v713_v24, %v711_v43  ;;  %v725_v58 = vmul.u32 %v721_v3, %v697_v27 }
  0xf6   : > { %v469_v44 = vadd.f32 -0.4999988, %v468_v33  ;;  %v476_v45 = vadd.f32 -0.16666654, %v475_v29  ;;  %v728_v61 = vshll.u32 %v724_v55, 16  ;;  %vm483_vm7 = vcmp.lt.s32.totalorder %v1670_v41, 2 }
  0xf7   : > { %vm730_vm8 = vc.u32 %v722_v52, %v726_v35  ;;  %v732_v9 = vadd.s32 %v726_v35, %v722_v52  ;;  %vm480_vm9 = vweird.f32 %v1438_v36  ;;  %v610_v16 = vand.u32 2147483647, %v609_v59 }
  0xf8   : > { %v470_v50 = vmul.f32 %v469_v44, %v465_v8  ;;  %v477_v51 = vmul.f32 %v476_v45, %v465_v8  ;;  %v612_v18 = vcvt.s32.f32 %v605_v39  ;;  %v716_v19 = vadd.s32 %v715_v48, %v705_v47 }
  0xf9   : > { %v731_v40 = vsel %vm730_vm8, 1, %v1279_v0  ;;  %vm734_vm10 = vc.u32 %v732_v9, %v728_v61  ;;  %v685_v3 = vsel %vm681_vm14, %v1638_v15, %v684_v54  ;;  %v707_v8 = vshrl.u32 %v1695_v6, 16 }
  0xfa   : > { %v471_v26 = vadd.f32 1.0, %v470_v50  ;;  %v478_v30 = vadd.f32 1.0, %v477_v51  ;;  %v733_v53 = vadd.s32 %v731_v40, %v725_v58  ;;  %v613_v27 = vmul.f32 %v612_v18, %v610_v16 }
  0xfb   : > { %v735_v52 = vsel %vm734_vm10, 1, %v1279_v0  ;;  %v727_v22 = vshrl.u32 %v723_v21, 16  ;;  %vm487_vm11 = vcmp.eq.s32.totalorder %v1670_v41, 2  ;;  %v617_v28 = vsel %vm494_vm3, %v616_v57, %v1636_v12 }
  0xfc   : > { %v479_v60 = vmul.f32 %v478_v30, %v1690_v56  ;;  %v488_v63 = vxor.u32 2147483648, %v471_v26  ;;  %v737_v23 = vadd.s32 %v735_v52, %v733_v53  ;;  %v614_v32 = vxor.u32 2147483648, %v613_v27 }
  0xfd   : > { %v1733_v15 = vadd.s32 %v716_v19, %v707_v8  ;;  %v729_v54 = vshrl.u32 %v724_v55, 16  ;;  %v805_v56 = vand.u32 2139095040, %v1674_v42  ;;  %v686_v31 = vsel %vm680_vm0, %v1701_v10, %v685_v3 }
  0xfe   : > { %v485_v6 = vxor.u32 2147483648, %v479_v60  ;;  %v738_v13 = vadd.s32 %v737_v23, %v727_v22  ;;  %v489_v1 = vsel %vm487_vm11, %v488_v63, %v479_v60  ;;  %v615_v21 = vsel %vm494_vm3, %v614_v32, %v613_v27 }
  0xff   : > { %v1741_v49 = vadd.s32 %v732_v9, %v728_v61  ;;  %v618_v57 = vsel %vm1713_vm6, %v1440_v37, %v615_v21  ;;  %v806_v33 = vshrl.u32 %v805_v56, 23  ;;  %v619_v2 = vsel %vm1713_vm6, 0, %v617_v28 }
 0x100   : > { %v486_v12 = vsel %vm484_vm5, %v471_v26, %v485_v6  ;;  %v739_v55 = vadd.s32 %v738_v13, %v729_v54  ;;  %v620_v35 = vmul.f32 %v618_v57, %v618_v57  ;;  %v740_v41 = vmul.u32 %v1659_v34, %v686_v31 }
 0x101   : > { %v490_v29 = vsel %vm483_vm7, %v486_v12, %v489_v1  ;;  %vm742_vm12 = vc.u32 %v1733_v15, %v1741_v49  ;;  %v1103_v39 = vadd.s32 4294967169, %v806_v33  ;;  %v636_v44 = vadd.s32 3, %v619_v2 }
 0x102   : > { %v491_v25 = vsel %vm480_vm9, nan, %v490_v29  ;;  %v743_v10 = vadd.s32 1, %v739_v55  ;;  %v621_v38 = vmul.f32 -0.001358992, %v620_v35  ;;  %v628_v43 = vmul.f32 -0.00019511016, %v620_v35 }
 0x103   : > { %973 = vst [vmem:[%s1756_s14 + $0x20] sm:$0xff] %v491_v25  ;;  %v802_v47 = vand.u32 2147483647, %v1674_v42  ;;  %v812_v24 = vadd.s32 1, %v1103_v39  ;;  %v637_v51 = vand.u32 3, %v636_v44  ;;  %vm635_vm2 = vweird.f32 %v1440_v37 }
 0x104   : > { %1106 = vst [vmem:[%s1756_s14 + $0x60] sm:$0xff] %v491_v25  ;;  %v744_v45 = vsel %vm742_vm12, %v743_v10, %v739_v55  ;;  %v622_v46 = vadd.f32 0.041655596, %v621_v38  ;;  %v629_v36 = vadd.f32 0.008332121, %v628_v43  ;;  %v741_v38 = vadd.s32 %v1741_v49, %v1733_v15 }
 0x105   : > { %v745_v59 = vadd.s32 %v744_v45, %v740_v41  ;;  %vm813_vm13 = vcmp.gt.s32.totalorder %v812_v24, 0  ;;  %v809_v9 = vand.u32 8388607, %v802_v47  ;;  %vm638_vm14 = vcmp.lt.s32.totalorder %v637_v51, 2 }
 0x106   : > { %v623_v48 = vmul.f32 %v622_v46, %v620_v35  ;;  %v630_v58 = vmul.f32 %v629_v36, %v620_v35  ;;  %v814_v50 = vsel %vm813_vm13, %v812_v24, 0  ;;  %vm639_vm15 = vcmp.eq.s32.totalorder %v637_v51, 0 }
 0x107   : > { %v746_v61 = vadd.s32 536870912, %v745_v59  ;;  %v816_v16 = vand.u32 31, %v814_v50  ;;  %vm642_vm0 = vcmp.eq.s32.totalorder %v637_v51, 2  ;;  %v810_v52 = vor.u32 8388608, %v809_v9 }
 0x108   : > { %v624_v34 = vadd.f32 -0.4999988, %v623_v48  ;;  %v631_v18 = vadd.f32 -0.16666654, %v630_v58  ;;  %v1769_v60 = vshrl.u32 %v814_v50, 5  ;;  %vm649_vm9 = vcmp.lt.s32.totalorder %v1461_v62, 0 }
 0x109   : > { %v1764_v19 = vshrl.u32 %v746_v61, 30  ;;  %v1766_v40 = vsub.s32 32, %v816_v16  ;;  %v819_v54 = vshll.u32 %v1280_v5, %v816_v16  ;;  %v822_v13 = vshll.u32 %v1281_v7, %v816_v16 }
 0x10a   : > { %v625_v26 = vmul.f32 %v624_v34, %v620_v35  ;;  %v632_v30 = vmul.f32 %v631_v18, %v620_v35  ;;  %v828_v56 = vshll.u32 %v1283_v14, %v816_v16  ;;  %v825_v12 = vshll.u32 %v1282_v11, %v816_v16 }
 0x10b   : > { %v748_v53 = vshll.u32 %v1764_v19, 30  ;;  %v820_v63 = vshrl.u32 %v1281_v7, %v1766_v40  ;;  %v823_v22 = vshrl.u32 %v1282_v11, %v1766_v40  ;;  %v826_v23 = vshrl.u32 %v1283_v14, %v1766_v40 }
 0x10c   : > { %v626_v27 = vadd.f32 1.0, %v625_v26  ;;  %v633_v3 = vadd.f32 1.0, %v632_v30  ;;  %v829_v1 = vshrl.u32 %v1284_v17, %v1766_v40  ;;  %v832_v55 = vshrl.u32 %v1285_v20, %v1766_v40 }
 0x10d   : > { %v749_v8 = vsub.s32 %v745_v59, %v748_v53  ;;  %v1785_v33 = vor.u32 %v820_v63, %v819_v54  ;;  %v1787_v29 = vor.u32 %v823_v22, %v822_v13  ;;  %v1791_v35 = vor.u32 %v826_v23, %v825_v12 }
 0x10e   : > { %v634_v32 = vmul.f32 %v633_v3, %v618_v57  ;;  %v643_v28 = vxor.u32 2147483648, %v626_v27  ;;  %v830_v2 = vor.u32 %v829_v1, %v828_v56  ;;  %v831_v25 = vshll.u32 %v1284_v17, %v816_v16 }
 0x10f   : > { %vm750_vm1 = vcmp.lt.s32.totalorder %v749_v8, 0  ;;  %v751_v6 = vsub.s32 0, %v749_v8  ;;  %vm834_vm3 = vcmp.lt.s32.totalorder %v1769_v60, 1  ;;  %vm837_vm4 = vcmp.lt.s32.totalorder %v1769_v60, 4 }
 0x110   : > { %v640_v21 = vxor.u32 2147483648, %v634_v32  ;;  %v644_v14 = vsel %vm642_vm0, %v643_v28, %v634_v32  ;;  %v833_v39 = vor.u32 %v832_v55, %v831_v25  ;;  %vm836_vm6 = vcmp.lt.s32.totalorder %v1769_v60, 3 }
 0x111   : > { %v752_v31 = vsel %vm750_vm1, %v751_v6, %v749_v8  ;;  %v842_v17 = vsel %vm834_vm3, %v1785_v33, %v1787_v29  ;;  %v843_v37 = vsel %vm837_vm4, %v830_v2, 920167782  ;;  %v1812_v44 = vshll.u32 %v810_v52, 8 }
 0x112   : > { %v753_v57 = vclz %v752_v31  ;;  %v641_v7 = vsel %vm639_vm15, %v626_v27, %v640_v21  ;;  %v844_v41 = vsel %vm836_vm6, %v1791_v35, %v843_v37  ;;  %vm835_vm7 = vcmp.lt.s32.totalorder %v1769_v60, 2 }
 0x113   : > { %v645_v11 = vsel %vm638_vm14, %v641_v7, %v644_v14  ;;  %v846_v46 = vsel %vm834_vm3, %v1787_v29, %v1791_v35  ;;  %v845_v36 = vsel %vm835_vm7, %v842_v17, %v844_v41  ;;  %v847_v15 = vsel %vm837_vm4, %v833_v39, 1326507024 }
 0x114   : > { %v1101_v20 = vadd.s32 4294967294, %v753_v57  ;;  %v646_v10 = vsel %vm635_vm2, nan, %v645_v11  ;;  %v848_v58 = vsel %vm836_vm6, %v830_v2, %v847_v15  ;;  %v851_v50 = vand.u32 65535, %v1812_v44 }
 0x115   : > { %974 = vst [vmem:[%s1756_s14 + $0x28] sm:$0xff] %v646_v10  ;;  %v849_v61 = vsel %vm835_vm7, %v846_v46, %v848_v58  ;;  %v875_v51 = vand.u32 65535, %v845_v36  ;;  %v876_v9 = vshrl.u32 %v845_v36, 16  ;;  %v852_v30 = vshrl.u32 %v1812_v44, 16 }
 0x116   : > { %vm1102_vm5 = vcmp.lt.s32.totalorder %v1101_v20, 0  ;;  %1107 = vst [vmem:[%s1756_s14 + $0x68] sm:$0xff] %v646_v10  ;;  %v853_v18 = vand.u32 65535, %v849_v61  ;;  %v854_v26 = vshrl.u32 %v849_v61, 16  ;;  %vm1831_vm8 = vcmp.le.f32.partialorder %v647_v4, 0.7853982 }
 0x117   : > { %v756_v43 = vsel %vm1102_vm5, 0, %v1101_v20  ;;  %v878_v53 = vmul.u32 %v876_v9, %v851_v50  ;;  %v877_v63 = vmul.u32 %v875_v51, %v851_v50  ;;  %v879_v22 = vmul.u32 %v875_v51, %v852_v30 }
 0x118   : > { %v757_v45 = vsub.s32 32, %v756_v43  ;;  %v761_v24 = vsub.s32 4294967266, %v756_v43  ;;  %v758_v49 = vshll.u32 %v749_v8, %v756_v43  ;;  %v856_v8 = vmul.u32 %v854_v26, %v851_v50 }
 0x119   : > { %v857_v52 = vmul.u32 %v853_v18, %v852_v30  ;;  %v881_v23 = vshll.u32 %v878_v53, 16  ;;  %v855_v6 = vmul.u32 %v853_v18, %v851_v50  ;;  %v858_v13 = vmul.u32 %v854_v26, %v852_v30 }
 0x11a   : > { %v759_v59 = vshrl.u32 %v741_v38, %v757_v45  ;;  %v762_v48 = vadd.s32 127, %v761_v24  ;;  %v859_v54 = vshll.u32 %v856_v8, 16  ;;  %v880_v1 = vmul.u32 %v876_v9, %v852_v30 }
 0x11b   : > { %v861_v56 = vshll.u32 %v857_v52, 16  ;;  %vm885_vm10 = vc.u32 %v877_v63, %v881_v23  ;;  %v883_v55 = vshll.u32 %v879_v22, 16  ;;  %v887_v57 = vadd.s32 %v881_v23, %v877_v63 }
 0x11c   : > { %v760_v16 = vor.u32 %v759_v59, %v758_v49  ;;  %v763_v34 = vshll.u32 %v762_v48, 23  ;;  %vm863_vm11 = vc.u32 %v855_v6, %v859_v54  ;;  %v865_v21 = vadd.s32 %v859_v54, %v855_v6 }
 0x11d   : > { %v886_v31 = vsel %vm885_vm10, 1, %v1279_v0  ;;  %v864_v12 = vsel %vm863_vm11, 1, %v1279_v0  ;;  %v771_v14 = vsub.s32 4, %v1764_v19  ;;  %v818_v11 = vshrl.u32 %v1280_v5, %v1766_v40 }
 0x11e   : > { %v764_v3 = vor.u32 4788187, %v763_v34  ;;  %v767_v28 = vcvt.s32.f32 %v760_v16  ;;  %v888_v2 = vadd.s32 %v886_v31, %v880_v1  ;;  %v866_v25 = vadd.s32 %v864_v12, %v858_v13 }
 0x11f   : > { %vm867_vm12 = vc.u32 %v865_v21, %v861_v56  ;;  %v839_v20 = vsel %vm837_vm4, %v1791_v35, 2102212464  ;;  %vm889_vm13 = vc.u32 %v887_v57, %v883_v55  ;;  %v860_v17 = vshrl.u32 %v856_v8, 16 }
 0x120   : > { %v765_v32 = vand.u32 2147483647, %v764_v3  ;;  %v868_v10 = vsel %vm867_vm12, 1, %v1279_v0  ;;  %v890_v38 = vsel %vm889_vm13, 1, %v1279_v0  ;;  %v838_v5 = vsel %vm834_vm3, %v818_v11, %v1785_v33 }
 0x121   : > { %v870_v37 = vadd.s32 %v868_v10, %v866_v25  ;;  %v882_v40 = vshrl.u32 %v878_v53, 16  ;;  %v892_v35 = vadd.s32 %v890_v38, %v888_v2  ;;  %v840_v45 = vsel %vm836_vm6, %v1787_v29, %v839_v20 }
 0x122   : > { %v768_v4 = vmul.f32 %v767_v28, %v765_v32  ;;  %v862_v24 = vshrl.u32 %v857_v52, 16  ;;  %v884_v36 = vshrl.u32 %v879_v22, 16  ;;  %v891_v48 = vadd.s32 %v887_v57, %v883_v55 }
 0x123   : > { %v871_v46 = vadd.s32 %v870_v37, %v860_v17  ;;  %v893_v15 = vadd.s32 %v892_v35, %v882_v40  ;;  %v772_v58 = vsel %vm649_vm9, %v771_v14, %v1764_v19  ;;  %v841_v33 = vsel %vm835_vm7, %v838_v5, %v840_v45  ;;  %v958_v17 = vld [vmem:[%s1401_s20 + $0x8] sm:$0xff]  ;;  %v959_v37 = vld [vmem:[%s1401_s20 + $0x10] sm:$0xff]  ;;  %v961_v5 = vld [vmem:[%s1401_s20 + $0x20] sm:$0xff] }
 0x124   : > { %v769_v7 = vxor.u32 2147483648, %v768_v4  ;;  %v774_v9 = vsel %vm1831_vm8, 0, %v772_v58  ;;  %v895_v18 = vmul.u32 %v1812_v44, %v841_v33  ;;  %vm790_vm3 = vweird.f32 %v1461_v62  ;;  %966 = vst [vmem:[%s1756_s14 + $0x8] sm:$0xff] %v958_v17  ;;  %v963_v45 = vld [vmem:[%s1401_s20 + $0x30] sm:$0xff] }
 0x125   : > { %v872_v59 = vadd.s32 %v871_v46, %v862_v24  ;;  %v894_v61 = vadd.s32 %v893_v15, %v884_v36  ;;  %v791_v19 = vadd.s32 3, %v774_v9  ;;  %967 = vst [vmem:[%s1756_s14 + $0x10] sm:$0xff] %v959_v37  ;;  %v964_v46 = vld [vmem:[%s1401_s20 + $0x38] sm:$0xff]  ;;  %vm804_vm5 = vcmp.lt.s32.totalorder %v1674_v42, 0 }
 0x126   : > { %v770_v39 = vsel %vm649_vm9, %v769_v7, %v768_v4  ;;  %969 = vst [vmem:[%s1756_s14 + $0x40] sm:$0xff] %v961_v5  ;;  %vm803_vm6 = vcmp.le.f32.partialorder %v802_v47, 0.7853982  ;;  %vm945_vm10 = vweird.f32 %v1674_v42 }
 0x127   : > { %v773_v43 = vsel %vm1831_vm8, %v1461_v62, %v770_v39  ;;  %vm897_vm14 = vc.u32 %v872_v59, %v891_v48  ;;  %v898_v29 = vadd.s32 1, %v894_v61  ;;  %v792_v32 = vand.u32 3, %v791_v19  ;;  %v957_v39 = vld [vmem:[%s1401_s20] sm:$0xff]  ;;  %971 = vst [vmem:[%s1756_s14 + $0x50] sm:$0xff] %v963_v45 }
 0x128   : > { %v775_v41 = vmul.f32 %v773_v43, %v773_v43  ;;  %v896_v2 = vadd.s32 %v891_v48, %v872_v59  ;;  %965 = vst [vmem:[%s1756_s14] sm:$0xff] %v957_v39 }
 0x129   : > { %v899_v26 = vsel %vm897_vm14, %v898_v29, %v894_v61  ;;  %vm793_vm15 = vcmp.lt.s32.totalorder %v792_v32, 2  ;;  %vm794_vm0 = vcmp.eq.s32.totalorder %v792_v32, 0  ;;  %vm797_vm1 = vcmp.eq.s32.totalorder %v792_v32, 2  ;;  %972 = vst [vmem:[%s1756_s14 + $0x58] sm:$0xff] %v964_v46 }
 0x12a   : > { %v776_v0 = vmul.f32 -0.001358992, %v775_v41  ;;  %v783_v49 = vmul.f32 -0.00019511016, %v775_v41  ;;  %v900_v3 = vadd.s32 %v899_v26, %v895_v18 }
 0x12c   : > { %v777_v50 = vadd.f32 0.041655596, %v776_v0  ;;  %v784_v51 = vadd.f32 0.008332121, %v783_v49  ;;  %v901_v52 = vadd.s32 536870912, %v900_v3 }
 0x12e   : > { %v778_v16 = vmul.f32 %v777_v50, %v775_v41  ;;  %v785_v34 = vmul.f32 %v784_v51, %v775_v41  ;;  %v902_v23 = vshrl.u32 %v901_v52, 30 }
 0x130   : > { %v779_v30 = vadd.f32 -0.4999988, %v778_v16  ;;  %v786_v53 = vadd.f32 -0.16666654, %v785_v34  ;;  %v903_v27 = vshll.u32 %v902_v23, 30  ;;  %v926_v0 = vsub.s32 4, %v902_v23 }
 0x132   : > { %v780_v8 = vmul.f32 %v779_v30, %v775_v41  ;;  %v787_v60 = vmul.f32 %v786_v53, %v775_v41  ;;  %v904_v13 = vsub.s32 %v900_v3, %v903_v27  ;;  %v962_v41 = vld [vmem:[%s1401_s20 + $0x28] sm:$0xff]  ;;  %v927_v33 = vsel %vm804_vm5, %v926_v0, %v902_v23 }
 0x133   : > { %970 = vst [vmem:[%s1756_s14 + $0x48] sm:$0xff] %v962_v41  ;;  %v929_v51 = vsel %vm803_vm6, 0, %v927_v33 }
 0x134   : > { %v781_v63 = vadd.f32 1.0, %v780_v8  ;;  %v788_v22 = vadd.f32 1.0, %v787_v60  ;;  %vm905_vm2 = vcmp.lt.s32.totalorder %v904_v13, 0  ;;  %v906_v1 = vsub.s32 0, %v904_v13 }
 0x135   : > { %v946_v18 = vadd.s32 3, %v929_v51 }
 0x136   : > { %v789_v28 = vmul.f32 %v788_v22, %v773_v43  ;;  %v798_v6 = vxor.u32 2147483648, %v781_v63  ;;  %v907_v31 = vsel %vm905_vm2, %v906_v1, %v904_v13  ;;  %v960_v43 = vld [vmem:[%s1401_s20 + $0x18] sm:$0xff]  ;;  %s1116_s20 = sshll.u32 %s1335_s19, 4  ;;  %s983_s19 = scalar_lea.sflag [#allocation4], %s1397_s8 }
 0x137   : > { %v908_v12 = vclz %v907_v31  ;;  %968 = vst [vmem:[%s1756_s14 + $0x18] sm:$0xff] %v960_v43  ;;  %v947_v3 = vand.u32 3, %v946_v18  ;;  %s994_s12 = scalar_lea.hbm %s1928_s4, %s1116_s20 }
 0x138   : > { %v795_v54 = vxor.u32 2147483648, %v789_v28  ;;  %v799_v56 = vsel %vm797_vm1, %v798_v6, %v789_v28  ;;  %s997_s22 = sshll.u32 %s994_s12, 4  ;;  %s998_s22 = int_to_ptr.hbm [resolvable:$true] %s997_s22 }
 0x139   : > { %v1104_v55 = vadd.s32 4294967294, %v908_v12  ;;  %vm949_vm7 = vcmp.eq.s32.totalorder %v947_v3, 0  ;;  %vm952_vm8 = vcmp.eq.s32.totalorder %v947_v3, 2  ;;  %vm948_vm9 = vcmp.lt.s32.totalorder %v947_v3, 2  ;;  %s1222_s23 = sshra.s32 %s998_s22, 4  ;;  %s1223_s23 = int_to_ptr.hbm [resolvable:$true] %s1222_s23 }
 0x13a   : > { %v796_v44 = vsel %vm794_vm0, %v781_v63, %v795_v54  ;;  %s1224_s26 = scalar_lea.hbm %s1223_s23, 128  ;;  %p1229_p2 = scmp.lt.s32.totalorder %s1223_s23, %s1928_s4 }
 0x13b   : > { %v800_v4 = vsel %vm793_vm15, %v796_v44, %v799_v56  ;;  %vm1105_vm4 = vcmp.lt.s32.totalorder %v1104_v55, 0  ;;  %p1225_p12 = scmp.ne.s32.totalorder %s1223_s23, %s1224_s26  ;;  %p1230_p3 = scmp.lt.s32.totalorder %s1228_s5, %s1224_s26 }
 0x13c   : > { %v801_v21 = vsel %vm790_vm3, nan, %v800_v4  ;;  %v911_v57 = vsel %vm1105_vm4, 0, %v1104_v55 }
 0x13d   : > { %975 = vst [vmem:[%s1756_s14 + $0x30] sm:$0xff] %v801_v21  ;;  %v912_v7 = vsub.s32 32, %v911_v57  ;;  %v916_v14 = vsub.s32 4294967266, %v911_v57  ;;  %v913_v62 = vshll.u32 %v904_v13, %v911_v57  ;;  %p1226_p13 = pnand %p1225_p12, %p1363_p10  ;;  %p1231_p4 = por %p1230_p3, %p1229_p2 }
 0x13e   : > { %1108 = vst [vmem:[%s1756_s14 + $0x70] sm:$0xff] %v801_v21 }
 0x13f   : > { %v914_v25 = vshrl.u32 %v896_v2, %v912_v7  ;;  %v917_v11 = vadd.s32 127, %v916_v14  ;;  %p1227_p1 = pneg %p1226_p13 }
 0x141   : > { %v915_v20 = vor.u32 %v914_v25, %v913_v62  ;;  %v918_v10 = vshll.u32 %v917_v11, 23  ;;  %p1232_p5 = pnand %p1231_p4, %p1227_p1 }
 0x143   : > { %v919_v38 = vor.u32 4788187, %v918_v10  ;;  %v922_v35 = vcvt.s32.f32 %v915_v20 }
 0x145   : > { %v920_v40 = vand.u32 2147483647, %v919_v38 }
 0x147   : > { %v923_v24 = vmul.f32 %v922_v35, %v920_v40 }
 0x149   : > { %v924_v36 = vxor.u32 2147483648, %v923_v24 }
 0x14b   : > { %v925_v15 = vsel %vm804_vm5, %v924_v36, %v923_v24 }
 0x14c   : > { %v928_v49 = vsel %vm803_vm6, %v1674_v42, %v925_v15 }
 0x14d   : > { %v930_v59 = vmul.f32 %v928_v49, %v928_v49 }
 0x14f   : > { %v931_v48 = vmul.f32 -0.001358992, %v930_v59  ;;  %v938_v58 = vmul.f32 -0.00019511016, %v930_v59 }
 0x151   : > { %v932_v61 = vadd.f32 0.041655596, %v931_v48  ;;  %v939_v50 = vadd.f32 0.008332121, %v938_v58 }
 0x153   : > { %v933_v29 = vmul.f32 %v932_v61, %v930_v59  ;;  %v940_v9 = vmul.f32 %v939_v50, %v930_v59 }
 0x155   : > { %v934_v16 = vadd.f32 -0.4999988, %v933_v29  ;;  %v941_v34 = vadd.f32 -0.16666654, %v940_v9 }
 0x157   : > { %v935_v26 = vmul.f32 %v934_v16, %v930_v59  ;;  %v942_v47 = vmul.f32 %v941_v34, %v930_v59 }
 0x159   : > { %v936_v30 = vadd.f32 1.0, %v935_v26  ;;  %v943_v53 = vadd.f32 1.0, %v942_v47 }
 0x15b   : > { %v944_v19 = vmul.f32 %v943_v53, %v928_v49  ;;  %v953_v8 = vxor.u32 2147483648, %v936_v30 }
 0x15d   : > { %v950_v60 = vxor.u32 2147483648, %v944_v19  ;;  %v954_v63 = vsel %vm952_vm8, %v953_v8, %v944_v19 }
 0x15f   : > { %v951_v52 = vsel %vm949_vm7, %v936_v30, %v950_v60 }
 0x160   : > { %v955_v22 = vsel %vm948_vm9, %v951_v52, %v954_v63 }
 0x161   : > { %v956_v23 = vsel %vm945_vm10, nan, %v955_v22 }
 0x162   : > { %976 = vst [vmem:[%s1756_s14 + $0x38] sm:$0xff] %v956_v23 }
 0x163   : > { %1109 = vst [vmem:[%s1756_s14 + $0x78] sm:$0xff] %v956_v23 }
 0x164   : > { %1235 = shalt.err (!%p1232_p5)
}
 0x165   : > { %s1286_s8 = smov 256   ;;  %s1287_s7 = smov 1024  }
 0x166   : > { %s1288_s10 = smov 16  }
 0x167   : > { %1119 = dma.vmem_to_hbm [thread:$0]  (%p1363_p10), %s996_s13, 2048, %s998_s22, %s983_s19, %s1286_s8, %s1287_s7, %s1288_s10  }
 0x168 PF: > { %p1130_p7 = scmp.ge.s32.totalorder %s1274_s18, 2  ;;  %s1012_s14 = sand.u32 1, %s1262_s15  }
 0x169   : > { %s1013_s20 = scalar_lea.sflag [#allocation4], %s1012_s14 }
 0x16a   : > { %p1126_p8 = pnand %p1130_p7, %p1367_p11 }
 0x16c   : > { %p1127_p9 = pneg %p1126_p8 }
 0x16e   : > { %1257 = dma.done.wait (%p1127_p9), %s1013_s20, 2048  }
 0x16f   : > { %1259 = vsyncadd (%p1127_p9), %s1013_s20, 4294965248  ;;  %p17_p0 = scmp.ge.s32.totalorder %s1339_s21, 6   ;;  %s1940_s15 = smov %s1266_s16 }
 0x170   : > { %s1941_s16 = smov %s1270_s17  ;;  %s1942_s17 = smov %s1351_s24 }
 0x171   : > { %s1943_s18 = smov %s1339_s21  ;;  %19 = sbr.rel (!%p17_p0) target bundleno = 5 (0x5), region = 91 }
 0x176   :  { %1019 = vsyncpa [#allocation3], 1 }
 0x177   :  { %1021 = vsyncpa [#allocation3 + $0x1], 1 }
 0x178   :  { %1022 = vsyncpa [#allocation4], 1 }
 0x179   :  { %1024 = vsyncpa [#allocation4 + $0x1], 1 }

</bundles_post_ra>
